<compile_context>
chip_gen: v7x
topology: tpu7x:2x2x1
jax: 0.10.0
libtpu: 0.0.40
codegen_flags: <defaults>
</compile_context>

<pallas_src>
import jax
import jax.numpy as jnp
from jax.experimental import pallas as pl
from jax.experimental.pallas import tpu as pltpu

NF = 64            # hidden width from the module (nf = 64)
LN_EPS = 1e-5      # nn.LayerNorm default eps
LEAKY_SLOPE = 0.2  # nn.LeakyReLU(0.2)
LANE = 128         # TPU lane width


def _round_up(x, m):
    return (x + m - 1) // m * m


def _leaky_relu(x):
    return jnp.where(x > 0, x, LEAKY_SLOPE * x)


def _layernorm_mxu(x, gamma, beta, ones_col):
    # Row mean / (biased) variance computed as tiny matmuls against a ones/NF
    # column so the cross-lane reductions ride the otherwise-idle MXU instead
    # of the XLU (the first slot to saturate once DMA is hidden).
    mu = jnp.dot(x, ones_col, preferred_element_type=jnp.float32)        # (TB, 1)
    xc = x - mu
    var = jnp.dot(xc * xc, ones_col, preferred_element_type=jnp.float32)  # (TB, 1)
    inv = jax.lax.rsqrt(var + LN_EPS)
    return xc * inv * gamma + beta


def init_pose_dec_kernel(z_ref, w1_ref, w2_ref, w3_ref, vec_ref, b3_ref, o_ref):
    """Fused MLP decoder over one batch tile."""
    x = z_ref[...].astype(jnp.float32)

    vecs = vec_ref[...]                     # (8, NF): b1,g1,be1,b2,g2,be2,pad,pad
    b1, g1, be1 = vecs[0:1, :], vecs[1:2, :], vecs[2:3, :]
    b2, g2, be2 = vecs[3:4, :], vecs[4:5, :], vecs[5:6, :]

    ones_col = jnp.full((NF, 1), 1.0 / NF, dtype=jnp.float32)

    # Layer 1: Linear + LayerNorm + LeakyReLU
    h = jnp.dot(x, w1_ref[...], preferred_element_type=jnp.float32) + b1
    h = _leaky_relu(_layernorm_mxu(h, g1, be1, ones_col))

    # Layer 2: Linear + LayerNorm + LeakyReLU
    h = jnp.dot(h, w2_ref[...], preferred_element_type=jnp.float32) + b2
    h = _leaky_relu(_layernorm_mxu(h, g2, be2, ones_col))

    # Layer 3: Linear (output columns padded to a multiple of 128 -> full vst)
    out = jnp.dot(h, w3_ref[...], preferred_element_type=jnp.float32) + b3_ref[...]
    o_ref[...] = out.astype(o_ref.dtype)


def init_pose_dec(z_init, params, *, block_batch=1024):
    """z_init: [B, dim_z_init] float32. Returns [B, pose_size] float32."""
    B, dim_z = z_init.shape
    w1, w2 = params["w1"], params["w2"]
    w3p, b3p, vecs = params["w3p"], params["b3p"], params["vecs"]
    pose_size = params["pose_size"]
    pose_pad = w3p.shape[1]

    # Batch tile: multiple of 8 sublanes; small batches collapse to one tile.
    tb = min(block_batch, _round_up(B, 8))
    bp = _round_up(B, tb)
    z = z_init if bp == B else jnp.pad(z_init, ((0, bp - B), (0, 0)))

    resident = lambda i: (0, 0)  # weights/biases stay in VMEM across iterations

    out_padded = pl.pallas_call(
        init_pose_dec_kernel,
        out_shape=jax.ShapeDtypeStruct((bp, pose_pad), jnp.float32),
        grid=(bp // tb,),
        in_specs=[
            pl.BlockSpec((tb, dim_z), lambda i: (i, 0)),   # z: tiled over batch
            pl.BlockSpec(w1.shape, resident),
            pl.BlockSpec(w2.shape, resident),
            pl.BlockSpec(w3p.shape, resident),
            pl.BlockSpec(vecs.shape, resident),
            pl.BlockSpec(b3p.shape, resident),
        ],
        out_specs=pl.BlockSpec((tb, pose_pad), lambda i: (i, 0)),
        compiler_params=pltpu.CompilerParams(
            dimension_semantics=("parallel",),        # 2x on v7x's two TCs
            vmem_limit_bytes=32 * 1024 * 1024,        # safe on v7x's 64 MiB VMEM
        ),
    )(z, w1, w2, w3p, vecs, b3p)

    return out_padded[:B, :pose_size]


def make_params(dim_z_init, pose_size, key):
    """Deterministic synthetic parameters (shapes match InitPose_Dec.__init__)."""
    ks = jax.random.split(key, 6)

    def lin(kw, kb, fan_in, fan_out):
        bound = 1.0 / jnp.sqrt(fan_in)
        w = jax.random.uniform(kw, (fan_in, fan_out), jnp.float32, -bound, bound)
        b = jax.random.uniform(kb, (1, fan_out), jnp.float32, -bound, bound)
        return w, b

    w1, b1 = lin(ks[0], ks[1], dim_z_init, NF)
    w2, b2 = lin(ks[2], ks[3], NF, NF)
    w3, b3 = lin(ks[4], ks[5], NF, pose_size)
    g1 = jnp.ones((1, NF), jnp.float32)
    be1 = jnp.zeros((1, NF), jnp.float32)
    g2 = jnp.ones((1, NF), jnp.float32)
    be2 = jnp.zeros((1, NF), jnp.float32)

    # Lane-dense output: pad last layer's N dim to a multiple of 128.
    pose_pad = _round_up(pose_size, LANE)
    w3p = jnp.zeros((NF, pose_pad), jnp.float32).at[:, :pose_size].set(w3)
    b3p = jnp.zeros((1, pose_pad), jnp.float32).at[:, :pose_size].set(b3)

    # Pack the six (1, NF) vectors into one (8, NF) array (rows 6-7 are padding).
    vecs = jnp.concatenate(
        [b1, g1, be1, b2, g2, be2, jnp.zeros((2, NF), jnp.float32)], axis=0)

    return {
        # kernel inputs
        "w1": w1, "w2": w2, "w3p": w3p, "b3p": b3p, "vecs": vecs,
        "pose_size": pose_size,
        # raw params (pure-JAX reference only)
        "b1": b1, "g1": g1, "be1": be1, "b2": b2, "g2": g2, "be2": be2,
        "w3": w3, "b3": b3,
    }


def _reference(z, p):
    # Pure-JAX reference mirroring the PyTorch forward.
    def ln(x, g, b):
        mu = jnp.mean(x, axis=-1, keepdims=True)
        var = jnp.mean((x - mu) ** 2, axis=-1, keepdims=True)
        return (x - mu) / jnp.sqrt(var + LN_EPS) * g + b

    def lrelu(x):
        return jnp.where(x > 0, x, LEAKY_SLOPE * x)

    h = lrelu(ln(z @ p["w1"] + p["b1"], p["g1"], p["be1"]))
    h = lrelu(ln(h @ p["w2"] + p["b2"], p["g2"], p["be2"]))
    return h @ p["w3"] + p["b3"]


if __name__ == "__main__":
    batch = 8
    dim_z_init = 32
    pose_size = 48

    key = jax.random.PRNGKey(0)
    kz, kp = jax.random.split(key)
    z = jax.random.normal(kz, (batch, dim_z_init), jnp.float32)
    params = make_params(dim_z_init, pose_size, kp)

    out = init_pose_dec(z, params)
    out = jax.block_until_ready(out)

    ref = _reference(z, params)
    assert out.shape == (batch, pose_size)
    assert jnp.allclose(out, ref, atol=1e-4, rtol=1e-4), "mismatch vs reference"
    print("KERNEL_OK")
</pallas_src>

<mosaic_0001>
module attributes {stable_mosaic.version = 11 : i64} {
  func.func @init_pose_dec_kernel(%arg0: i32, %arg1: memref<8x32xf32, #tpu.memory_space<vmem>>, %arg2: memref<32x64xf32, #tpu.memory_space<vmem>>, %arg3: memref<64x64xf32, #tpu.memory_space<vmem>>, %arg4: memref<64x128xf32, #tpu.memory_space<vmem>>, %arg5: memref<8x64xf32, #tpu.memory_space<vmem>>, %arg6: memref<1x128xf32, #tpu.memory_space<vmem>>, %arg7: memref<8x128xf32, #tpu.memory_space<vmem>>) attributes {dimension_semantics = [#tpu.dimension_semantics<parallel>], iteration_bounds = array<i64: 1>, scalar_prefetch = 0 : i64, scratch_operands = 0 : i64, tpu.core_type = #tpu.core_type<tc>, window_params = [{transform_indices = @transform_0, window_bounds = array<i64: 8, 32>}, {pipeline_mode = #tpu.pipeline_mode<synchronous>, transform_indices = @transform_1, window_bounds = array<i64: 32, 64>}, {pipeline_mode = #tpu.pipeline_mode<synchronous>, transform_indices = @transform_2, window_bounds = array<i64: 64, 64>}, {pipeline_mode = #tpu.pipeline_mode<synchronous>, transform_indices = @transform_3, window_bounds = array<i64: 64, 128>}, {pipeline_mode = #tpu.pipeline_mode<synchronous>, transform_indices = @transform_4, window_bounds = array<i64: 8, 64>}, {pipeline_mode = #tpu.pipeline_mode<synchronous>, transform_indices = @transform_5, window_bounds = array<i64: 1, 128>}, {transform_indices = @transform_6, window_bounds = array<i64: 8, 128>}]} {
    %c0 = arith.constant 0 : index
    %c0_0 = arith.constant 0 : index
    %0 = vector.load %arg1[%c0, %c0_0] : memref<8x32xf32, #tpu.memory_space<vmem>>, vector<8x32xf32>
    %c0_1 = arith.constant 0 : index
    %c0_2 = arith.constant 0 : index
    %1 = vector.load %arg5[%c0_1, %c0_2] : memref<8x64xf32, #tpu.memory_space<vmem>>, vector<8x64xf32>
    %2 = vector.extract_strided_slice %1 {offsets = [0, 0], sizes = [1, 64], strides = [1, 1]} : vector<8x64xf32> to vector<1x64xf32>
    %3 = vector.extract_strided_slice %1 {offsets = [1, 0], sizes = [1, 64], strides = [1, 1]} : vector<8x64xf32> to vector<1x64xf32>
    %4 = vector.extract_strided_slice %1 {offsets = [2, 0], sizes = [1, 64], strides = [1, 1]} : vector<8x64xf32> to vector<1x64xf32>
    %5 = vector.extract_strided_slice %1 {offsets = [3, 0], sizes = [1, 64], strides = [1, 1]} : vector<8x64xf32> to vector<1x64xf32>
    %6 = vector.extract_strided_slice %1 {offsets = [4, 0], sizes = [1, 64], strides = [1, 1]} : vector<8x64xf32> to vector<1x64xf32>
    %7 = vector.extract_strided_slice %1 {offsets = [5, 0], sizes = [1, 64], strides = [1, 1]} : vector<8x64xf32> to vector<1x64xf32>
    %cst = arith.constant 1.562500e-02 : f32
    %8 = vector.broadcast %cst : f32 to vector<64x1xf32>
    %c0_3 = arith.constant 0 : index
    %c0_4 = arith.constant 0 : index
    %9 = vector.load %arg2[%c0_3, %c0_4] : memref<32x64xf32, #tpu.memory_space<vmem>>, vector<32x64xf32>
    %cst_5 = arith.constant dense<0.000000e+00> : vector<8x64xf32>
    %10 = tpu.matmul %0, %9, %cst_5 {dimension_numbers = #tpu.dot_dimension_numbers<[1], [0], [0], [1], [0, 0, 1, 1], [], []>} : vector<8x32xf32>, vector<32x64xf32>, vector<8x64xf32> -> vector<8x64xf32>
    %11 = vector.broadcast %2 : vector<1x64xf32> to vector<8x64xf32>
    %12 = arith.addf %10, %11 : vector<8x64xf32>
    %cst_6 = arith.constant dense<0.000000e+00> : vector<8x1xf32>
    %13 = tpu.matmul %12, %8, %cst_6 {dimension_numbers = #tpu.dot_dimension_numbers<[1], [0], [0], [1], [0, 0, 1, 1], [], []>} : vector<8x64xf32>, vector<64x1xf32>, vector<8x1xf32> -> vector<8x1xf32>
    %14 = vector.broadcast %13 : vector<8x1xf32> to vector<8x64xf32>
    %15 = arith.subf %12, %14 : vector<8x64xf32>
    %16 = arith.mulf %15, %15 : vector<8x64xf32>
    %cst_7 = arith.constant dense<0.000000e+00> : vector<8x1xf32>
    %17 = tpu.matmul %16, %8, %cst_7 {dimension_numbers = #tpu.dot_dimension_numbers<[1], [0], [0], [1], [0, 0, 1, 1], [], []>} : vector<8x64xf32>, vector<64x1xf32>, vector<8x1xf32> -> vector<8x1xf32>
    %cst_8 = arith.constant 9.99999974E-6 : f32
    %18 = vector.broadcast %cst_8 : f32 to vector<8x1xf32>
    %19 = arith.addf %17, %18 : vector<8x1xf32>
    %20 = math.rsqrt %19 : vector<8x1xf32>
    %21 = vector.broadcast %20 : vector<8x1xf32> to vector<8x64xf32>
    %22 = arith.mulf %15, %21 : vector<8x64xf32>
    %23 = vector.broadcast %3 : vector<1x64xf32> to vector<8x64xf32>
    %24 = arith.mulf %22, %23 : vector<8x64xf32>
    %25 = vector.broadcast %4 : vector<1x64xf32> to vector<8x64xf32>
    %26 = arith.addf %24, %25 : vector<8x64xf32>
    %cst_9 = arith.constant 0.000000e+00 : f32
    %27 = vector.broadcast %cst_9 : f32 to vector<8x64xf32>
    %28 = arith.cmpf ogt, %26, %27 : vector<8x64xf32>
    %cst_10 = arith.constant 2.000000e-01 : f32
    %29 = vector.broadcast %cst_10 : f32 to vector<8x64xf32>
    %30 = arith.mulf %29, %26 : vector<8x64xf32>
    %31 = arith.select %28, %26, %30 : vector<8x64xi1>, vector<8x64xf32>
    %c0_11 = arith.constant 0 : index
    %c0_12 = arith.constant 0 : index
    %32 = vector.load %arg3[%c0_11, %c0_12] : memref<64x64xf32, #tpu.memory_space<vmem>>, vector<64x64xf32>
    %cst_13 = arith.constant dense<0.000000e+00> : vector<8x64xf32>
    %33 = tpu.matmul %31, %32, %cst_13 {dimension_numbers = #tpu.dot_dimension_numbers<[1], [0], [0], [1], [0, 0, 1, 1], [], []>} : vector<8x64xf32>, vector<64x64xf32>, vector<8x64xf32> -> vector<8x64xf32>
    %34 = vector.broadcast %5 : vector<1x64xf32> to vector<8x64xf32>
    %35 = arith.addf %33, %34 : vector<8x64xf32>
    %cst_14 = arith.constant dense<0.000000e+00> : vector<8x1xf32>
    %36 = tpu.matmul %35, %8, %cst_14 {dimension_numbers = #tpu.dot_dimension_numbers<[1], [0], [0], [1], [0, 0, 1, 1], [], []>} : vector<8x64xf32>, vector<64x1xf32>, vector<8x1xf32> -> vector<8x1xf32>
    %37 = vector.broadcast %36 : vector<8x1xf32> to vector<8x64xf32>
    %38 = arith.subf %35, %37 : vector<8x64xf32>
    %39 = arith.mulf %38, %38 : vector<8x64xf32>
    %cst_15 = arith.constant dense<0.000000e+00> : vector<8x1xf32>
    %40 = tpu.matmul %39, %8, %cst_15 {dimension_numbers = #tpu.dot_dimension_numbers<[1], [0], [0], [1], [0, 0, 1, 1], [], []>} : vector<8x64xf32>, vector<64x1xf32>, vector<8x1xf32> -> vector<8x1xf32>
    %cst_16 = arith.constant 9.99999974E-6 : f32
    %41 = vector.broadcast %cst_16 : f32 to vector<8x1xf32>
    %42 = arith.addf %40, %41 : vector<8x1xf32>
    %43 = math.rsqrt %42 : vector<8x1xf32>
    %44 = vector.broadcast %43 : vector<8x1xf32> to vector<8x64xf32>
    %45 = arith.mulf %38, %44 : vector<8x64xf32>
    %46 = vector.broadcast %6 : vector<1x64xf32> to vector<8x64xf32>
    %47 = arith.mulf %45, %46 : vector<8x64xf32>
    %48 = vector.broadcast %7 : vector<1x64xf32> to vector<8x64xf32>
    %49 = arith.addf %47, %48 : vector<8x64xf32>
    %cst_17 = arith.constant 0.000000e+00 : f32
    %50 = vector.broadcast %cst_17 : f32 to vector<8x64xf32>
    %51 = arith.cmpf ogt, %49, %50 : vector<8x64xf32>
    %cst_18 = arith.constant 2.000000e-01 : f32
    %52 = vector.broadcast %cst_18 : f32 to vector<8x64xf32>
    %53 = arith.mulf %52, %49 : vector<8x64xf32>
    %54 = arith.select %51, %49, %53 : vector<8x64xi1>, vector<8x64xf32>
    %c0_19 = arith.constant 0 : index
    %c0_20 = arith.constant 0 : index
    %55 = vector.load %arg4[%c0_19, %c0_20] : memref<64x128xf32, #tpu.memory_space<vmem>>, vector<64x128xf32>
    %cst_21 = arith.constant dense<0.000000e+00> : vector<8x128xf32>
    %56 = tpu.matmul %54, %55, %cst_21 {dimension_numbers = #tpu.dot_dimension_numbers<[1], [0], [0], [1], [0, 0, 1, 1], [], []>} : vector<8x64xf32>, vector<64x128xf32>, vector<8x128xf32> -> vector<8x128xf32>
    %c0_22 = arith.constant 0 : index
    %c0_23 = arith.constant 0 : index
    %57 = vector.load %arg6[%c0_22, %c0_23] : memref<1x128xf32, #tpu.memory_space<vmem>>, vector<1x128xf32>
    %58 = vector.broadcast %57 : vector<1x128xf32> to vector<8x128xf32>
    %59 = arith.addf %56, %58 : vector<8x128xf32>
    %c0_24 = arith.constant 0 : index
    %c0_25 = arith.constant 0 : index
    %60 = vector.load %arg7[%c0_24, %c0_25] : memref<8x128xf32, #tpu.memory_space<vmem>>, vector<8x128xf32>
    tpu.vector_store %arg7[%c0_24, %c0_25], %59 {strides = array<i32>} : memref<8x128xf32, #tpu.memory_space<vmem>>, vector<8x128xf32>,
    return
  }
  func.func @transform_0(%arg0: i32) -> (i32, i32) {
    %c0_i32 = arith.constant 0 : i32
    %c0_i32_0 = arith.constant 0 : i32
    return %arg0, %c0_i32 : i32, i32
  }
  func.func @transform_1(%arg0: i32) -> (i32, i32) {
    %c0_i32 = arith.constant 0 : i32
    %c0_i32_0 = arith.constant 0 : i32
    %c0_i32_1 = arith.constant 0 : i32
    return %c0_i32, %c0_i32_0 : i32, i32
  }
  func.func @transform_2(%arg0: i32) -> (i32, i32) {
    %c0_i32 = arith.constant 0 : i32
    %c0_i32_0 = arith.constant 0 : i32
    %c0_i32_1 = arith.constant 0 : i32
    return %c0_i32, %c0_i32_0 : i32, i32
  }
  func.func @transform_3(%arg0: i32) -> (i32, i32) {
    %c0_i32 = arith.constant 0 : i32
    %c0_i32_0 = arith.constant 0 : i32
    %c0_i32_1 = arith.constant 0 : i32
    return %c0_i32, %c0_i32_0 : i32, i32
  }
  func.func @transform_4(%arg0: i32) -> (i32, i32) {
    %c0_i32 = arith.constant 0 : i32
    %c0_i32_0 = arith.constant 0 : i32
    %c0_i32_1 = arith.constant 0 : i32
    return %c0_i32, %c0_i32_0 : i32, i32
  }
  func.func @transform_5(%arg0: i32) -> (i32, i32) {
    %c0_i32 = arith.constant 0 : i32
    %c0_i32_0 = arith.constant 0 : i32
    %c0_i32_1 = arith.constant 0 : i32
    return %c0_i32, %c0_i32_0 : i32, i32
  }
  func.func @transform_6(%arg0: i32) -> (i32, i32) {
    %c0_i32 = arith.constant 0 : i32
    %c0_i32_0 = arith.constant 0 : i32
    return %arg0, %c0_i32 : i32, i32
  }
}

</mosaic_0001>

<bundles_post_ra>
// kernel: tpu_custom_call.1
= control target key start
LH: loop header
LB: loop body
LE: loop exit
PB: predicated region body
PF: predicated region fallthrough
CT: control target
= control target key end

     0   :  { %11 = vsyncpa [#allocation3], 0  ;;  %s1289_s0 = inlined_call_operand.hbm [shape: f32[8,32], index: 0, kind: input, shape index: {}]   ;;  %s1290_s1 = inlined_call_operand.hbm [shape: f32[32,64], index: 1, kind: input, shape index: {}]   ;;  %s1291_s2 = inlined_call_operand.hbm [shape: f32[64,64], index: 2, kind: input, shape index: {}]   ;;  %s1292_s3 = inlined_call_operand.hbm [shape: f32[64,128], index: 3, kind: input, shape index: {}]   ;;  %s1293_s4 = inlined_call_operand.vmem [shape: f32[8,64], index: 4, kind: input, shape index: {}]   ;;  %s1294_s5 = inlined_call_operand.vmem [shape: f32[1,128], index: 5, kind: input, shape index: {}]   ;;  %s1295_s6 = inlined_call_operand.hbm [shape: f32[8,128], index: 6, kind: output, shape index: {}]  }
   0x1   :  { %12 = vsyncpa [#allocation6], 0 }
   0x2   :  { %13 = vsyncpa [#allocation9], 0 }
   0x3   :  { %14 = vsyncpa [#allocation4], 0  ;;  %s1089_s21 = smov [#allocation5]   ;;  %s971_s25 = scalar_lea.hbm %s1290_s1, 512 }
   0x4   :  { %s30_s22 = sshll.u32 %s1089_s21, 4  ;;  %p972_p0 = scmp.ne.s32.totalorder %s1290_s1, %s971_s25  ;;  %s31_s22 = int_to_ptr.vmem [resolvable:$true] %s30_s22 }
   0x5   :  { %p975_p1 = scmp.lt.u32.totalorder %s971_s25, %s1290_s1 }
   0x7   :  { %p977_p2 = pnand %p975_p1, %p972_p0 }
   0x9   :  { %980 = shalt.err (!%p977_p2)
}
   0xa   :  { %s981_s30 = scalar_lea.vmem %s31_s22, 512  ;;  %p986_p4 = scmp.lt.s32.totalorder %s31_s22, %s31_s22 }
   0xb   :  { %p982_p3 = scmp.ne.s32.totalorder %s31_s22, %s981_s30  ;;  %p987_p5 = scmp.lt.s32.totalorder %s981_s30, %s981_s30 }
   0xd   :  { %p988_p6 = por %p987_p5, %p986_p4 }
   0xf   :  { %p989_p7 = pnand %p988_p6, %p982_p3 }
  0x11   :  { %992 = shalt.err (!%p989_p7)
}
  0x12   :  { %s1090_s7 = smov 128   ;;  %s1091_s8 = smov 8  }
  0x13   :  { %36 = dma.hbm_to_vmem [thread:$0]  %s1290_s1, 512, %s31_s22, [#allocation6], %s1090_s7, %s1090_s7, %s1091_s8  }
  0x14   :  { %s1092_s11 = smov [#allocation2]   ;;  %s1093_s13 = smov [#allocation7]  }
  0x15   :  { %s21_s12 = sshll.u32 %s1092_s11, 4  ;;  %s42_s14 = sshll.u32 %s1093_s13, 4  ;;  %s22_s12 = int_to_ptr.vmem [resolvable:$true] %s21_s12  ;;  %s43_s14 = int_to_ptr.vmem [resolvable:$true] %s42_s14 }
  0x16   :  { %s993_s17 = scalar_lea.hbm %s1289_s0, 128 }
  0x17   :  { %p994_p8 = scmp.ne.s32.totalorder %s1289_s0, %s993_s17  ;;  %p997_p9 = scmp.lt.u32.totalorder %s993_s17, %s1289_s0 }
  0x19   :  { %p999_p10 = pnand %p997_p9, %p994_p8 }
  0x1b   :  { %1002 = shalt.err (!%p999_p10)
}
  0x1c   :  { %s1003_s1 = scalar_lea.vmem %s22_s12, 128  ;;  %p1008_p12 = scmp.lt.s32.totalorder %s22_s12, %s22_s12 }
  0x1d   :  { %p1004_p11 = scmp.ne.s32.totalorder %s22_s12, %s1003_s1  ;;  %p1009_p13 = scmp.lt.s32.totalorder %s1003_s1, %s1003_s1 }
  0x1f   :  { %p1010_p0 = por %p1009_p13, %p1008_p12 }
  0x21   :  { %p1011_p1 = pnand %p1010_p0, %p1004_p11 }
  0x23   :  { %1014 = shalt.err (!%p1011_p1)
}
  0x24   :  { %24 = dma.hbm_to_vmem [thread:$0]  %s1289_s0, 128, %s22_s12, [#allocation3]  }
  0x25   :  { %s1015_s26 = scalar_lea.hbm %s1291_s2, 1024 }
  0x26   :  { %p1016_p2 = scmp.ne.s32.totalorder %s1291_s2, %s1015_s26  ;;  %p1019_p3 = scmp.lt.u32.totalorder %s1015_s26, %s1291_s2 }
  0x28   :  { %p1021_p4 = pnand %p1019_p3, %p1016_p2 }
  0x2a   :  { %1024 = shalt.err (!%p1021_p4)
}
  0x2b   :  { %s1025_s9 = scalar_lea.vmem %s43_s14, 1024  ;;  %p1030_p6 = scmp.lt.s32.totalorder %s43_s14, %s43_s14 }
  0x2c   :  { %p1026_p5 = scmp.ne.s32.totalorder %s43_s14, %s1025_s9  ;;  %p1031_p7 = scmp.lt.s32.totalorder %s1025_s9, %s1025_s9 }
  0x2e   :  { %p1032_p8 = por %p1031_p7, %p1030_p6 }
  0x30   :  { %p1033_p9 = pnand %p1032_p8, %p1026_p5 }
  0x32   :  { %1036 = shalt.err (!%p1033_p9)
}
  0x33   :  { %48 = dma.hbm_to_vmem [thread:$0]  %s1291_s2, 1024, %s43_s14, [#allocation6], %s1090_s7, %s1090_s7, %s1091_s8  }
  0x34   :  { %s1094_s11 = smov [#allocation8]   ;;  %s1037_s16 = scalar_lea.hbm %s1292_s3, 1024 }
  0x35   :  { %s54_s12 = sshll.u32 %s1094_s11, 4  ;;  %p1038_p10 = scmp.ne.s32.totalorder %s1292_s3, %s1037_s16  ;;  %s55_s12 = int_to_ptr.vmem [resolvable:$true] %s54_s12 }
  0x36   :  { %p1041_p11 = scmp.lt.u32.totalorder %s1037_s16, %s1292_s3 }
  0x38   :  { %p1043_p12 = pnand %p1041_p11, %p1038_p10 }
  0x3a   :  { %1046 = shalt.err (!%p1043_p12)
}
  0x3b   :  { %s1047_s21 = scalar_lea.vmem %s55_s12, 1024  ;;  %p1052_p0 = scmp.lt.s32.totalorder %s55_s12, %s55_s12 }
  0x3c   :  { %p1048_p13 = scmp.ne.s32.totalorder %s55_s12, %s1047_s21  ;;  %p1053_p1 = scmp.lt.s32.totalorder %s1047_s21, %s1047_s21 }
  0x3e   :  { %p1054_p2 = por %p1053_p1, %p1052_p0 }
  0x40   :  { %p1055_p3 = pnand %p1054_p2, %p1048_p13 }
  0x42   :  { %1058 = shalt.err (!%p1055_p3)
}
  0x43   :  { %60 = dma.hbm_to_vmem [thread:$0]  %s1292_s3, 1024, %s55_s12, [#allocation9], %s1090_s7, %s1090_s7, %s1091_s8  }
  0x44   :  { %1081 = dma.done.wait [#allocation3], 128  }
  0x45   :  { %1082 = vsyncadd [#allocation3], 4294967168 }
  0x46   :  { %1083 = dma.done.wait [#allocation6], 1536  }
  0x47   :  { %1084 = vsyncadd [#allocation6], 4294965760 }
  0x48   :  { %1085 = dma.done.wait [#allocation9], 1024  }
  0x49   :  { %1086 = vsyncadd [#allocation9], 4294966272  ;;  %v1095_v0 = vmov 0.0|0.0   ;;  %vm1096_vm0 = vmmov 0   ;;  %v1097_v1 = vmov 0.0   ;;  %v79_v3 = vld [vmem:[#allocation5] sm:$0xff]  ;;  %v83_v11 = vlaneseq }
  0x4a   :  { %891 = vmatprep.subr.bf16.mxu0 %v1095_v0  ;;  %774 = vmatprep.mubr.msk.f32.mxu0 %vm1096_vm0, %v1097_v1  ;;  %v1098_v2 = vmov 0.015625|0.015625   ;;  %v80_v4 = vld [vmem:[#allocation5 + $0x8] sm:$0xff]  ;;  %v81_v5 = vld [vmem:[#allocation5 + $0x10] sm:$0xff]  ;;  %v82_v7 = vld [vmem:[#allocation5 + $0x18] sm:$0xff]  ;;  %vm87_vm1 = vcmask 261120  }
  0x4b   :  { %897 = vmatprep.subr.bf16.mxu1 %v1095_v0  ;;  %793 = vmatprep.mubr.msk.f32.mxu1 %vm1096_vm0, %v1097_v1  ;;  %v892_v6 = vpack.c.bf16 %v80_v4, %v79_v3  ;;  %v895_v8 = vpack.c.bf16 %v82_v7, %v81_v5  ;;  %v77_v9 = vld [vmem:[#allocation2] sm:$0xff]  ;;  %v1099_v10 = vmov 0   ;;  %v1219_v12 = vshrl.u32 %v83_v11, 7  ;;  %v335_v24 = vld [vmem:[#allocation7] sm:$0xff]  ;;  %v336_v25 = vld [vmem:[#allocation7 + $0x8] sm:$0xff]  ;;  %s1100_s1 = smov [#allocation10]  }
  0x4c   :  { %898 = vmatpush3.bf16.msra.mxu1 %v1098_v2  ;;  %965 = vset.pattern.permute.xlu0 %v1099_v10  ;;  %v1225_v14 = vld [vmem:[%s1293_s4] sm:$0xff]  ;;  %vm161_vm2 = vcmask 523264   ;;  %v337_v26 = vld [vmem:[#allocation7 + $0x10] sm:$0xff]  ;;  %v914_v27 = vpack.c.bf16 %v336_v25, %v335_v24  ;;  %v339_v34 = vld [vmem:[#allocation7 + $0x20] sm:$0xff]  ;;  %s688_s22 = sshll.u32 %s1100_s1, 4  ;;  %s689_s22 = int_to_ptr.vmem [resolvable:$true] %s688_s22 }
  0x4d   :  { %899 = vmatprep.subr.bf16.mxu1 %v1095_v0  ;;  %893 = vmatpush3.bf16.msra.mxu0 %v892_v6  ;;  %v85_v13 = vsub.s32 0, %v1219_v12  ;;  %v338_v28 = vld [vmem:[#allocation7 + $0x18] sm:$0xff]  ;;  %v340_v35 = vld [vmem:[#allocation7 + $0x28] sm:$0xff]  ;;  %v341_v37 = vld [vmem:[#allocation7 + $0x30] sm:$0xff]  ;;  %v324_v40 = vsub.s32 1, %v1219_v12  ;;  %v329_v41 = vsub.s32 2, %v1219_v12  ;;  %p1064_p5 = scmp.lt.s32.totalorder %s689_s22, %s689_s22 }
  0x4e   :  { %894 = vmatprep.subr.bf16.mxu0 %v1095_v0  ;;  %966 = vset.pattern.permute.xlu1 %v1099_v10  ;;  %v917_v29 = vpack.c.bf16 %v338_v28, %v337_v26  ;;  %v920_v36 = vpack.c.bf16 %v340_v35, %v339_v34  ;;  %v342_v38 = vld [vmem:[#allocation7 + $0x38] sm:$0xff]  ;;  %v345_v50 = vsub.s32 3, %v1219_v12  ;;  %v593_v60 = vld [vmem:[#allocation8] sm:$0xff]  ;;  %v594_v61 = vld [vmem:[#allocation8 + $0x8] sm:$0xff]  ;;  %s1059_s23 = scalar_lea.vmem %s689_s22, 128 }
  0x4f   :  { %v86_v15 = vrot.slane %v1225_v14, %v85_v13  ;;  %v923_v39 = vpack.c.bf16 %v342_v38, %v341_v37  ;;  %v325_v42 = vrot.slane %v1225_v14, %v324_v40  ;;  %v330_v44 = vrot.slane %v1225_v14, %v329_v41  ;;  %v595_v62 = vld [vmem:[#allocation8 + $0x10] sm:$0xff]  ;;  %v597_v7 = vld [vmem:[#allocation8 + $0x20] sm:$0xff]  ;;  %v600_v11 = vld [vmem:[#allocation8 + $0x38] sm:$0xff]  ;;  %p1060_p4 = scmp.ne.s32.totalorder %s689_s22, %s1059_s23  ;;  %p1065_p6 = scmp.lt.s32.totalorder %s1059_s23, %s1059_s23 }
  0x50   :  { %900 = vmatpush3.bf16.msra.mxu1 %v1098_v2  ;;  %v346_v51 = vrot.slane %v1225_v14, %v345_v50  ;;  %v942_v63 = vpack.c.bf16 %v594_v61, %v593_v60  ;;  %v599_v10 = vld [vmem:[#allocation8 + $0x30] sm:$0xff] }
  0x51   :  { %901 = vmatprep.subr.bf16.mxu1 %v1095_v0  ;;  %896 = vmatpush3.bf16.msra.mxu0 %v895_v8  ;;  %v598_v8 = vld [vmem:[#allocation8 + $0x28] sm:$0xff]  ;;  %v951_v13 = vpack.c.bf16 %v600_v11, %v599_v10  ;;  %p1066_p7 = por %p1065_p6, %p1064_p5 }
  0x52   :  { %905 = vmatprep.subr.bf16.mxu0 %v1095_v0 }
  0x53   :  { %p1067_p8 = pnand %p1066_p7, %p1060_p4 }
  0x54   :  { %902 = vmatpush3.bf16.msra.mxu1 %v1098_v2  ;;  %775 = vmatmul.mubr.msk.f32.vlgmr.msra.gmra.mrb[0].mxu0 %vm87_vm1, %v77_v9  ;;  %v948_v9 = vpack.c.bf16 %v598_v8, %v597_v7 }
  0x55   :  { %903 = vmatprep.subr.bf16.mxu1 %v1095_v0  ;;  %906 = vmatpush3.bf16.msra.mxu0 %v1098_v2 }
  0x56   :  { %812 = vmatprep.mubr.msk.f32.mxu0 %vm1096_vm0, %v1097_v1  ;;  %907 = vmatprep.subr.bf16.mxu0 %v1095_v0 }
  0x58   :  { %904 = vmatpush3.bf16.msra.mxu1 %v1098_v2 }
  0x59   :  { %913 = vmatprep.subr.bf16.mxu1 %v1095_v0  ;;  %908 = vmatpush3.bf16.msra.mxu0 %v1098_v2 }
  0x5a   :  { %909 = vmatprep.subr.bf16.mxu0 %v1095_v0 }
  0x5d   :  { %910 = vmatpush3.bf16.msra.mxu0 %v1098_v2 }
  0x5e   :  { %911 = vmatprep.subr.bf16.mxu0 %v1095_v0 }
  0x61   :  { %912 = vmatpush3.bf16.msra.mxu0 %v1098_v2 }
  0x62   :  { %925 = vmatprep.subr.bf16.mxu0 %v1095_v0 }
 0x127   :  { %v157_v16 = vpop.f32.mrb[0].mxu0 }
 0x128   :  { %v158_v17 = vadd.f32 %v157_v16, %v86_v15  ;;  %v776_v18 = vpop.f32.mrb[1].mxu0  ;;  %v582_v15 = vsub.s32 4, %v1219_v12  ;;  %v587_v16 = vsub.s32 5, %v1219_v12 }
 0x12a   :  { %794 = vmatmul.mubr.msk.f32.vlgmr.msra.gmra.mrb[0].mxu1 %vm161_vm2, %v158_v17 }
 0x12b   :  { %831 = vmatprep.mubr.msk.f32.mxu1 %vm1096_vm0, %v1097_v1  ;;  %915 = vmatpush3.bf16.msra.mxu1 %v914_v27 }
 0x12c   :  { %916 = vmatprep.subr.bf16.mxu1 %v1095_v0 }
 0x12f   :  { %918 = vmatpush3.bf16.msra.mxu1 %v917_v29 }
 0x130   :  { %919 = vmatprep.subr.bf16.mxu1 %v1095_v0 }
 0x133   :  { %921 = vmatpush3.bf16.msra.mxu1 %v920_v36 }
 0x134   :  { %922 = vmatprep.subr.bf16.mxu1 %v1095_v0 }
 0x137   :  { %924 = vmatpush3.bf16.msra.mxu1 %v923_v39 }
 0x138   :  { %933 = vmatprep.subr.bf16.mxu1 %v1095_v0 }
 0x1fd   :  { %v231_v19 = vpop.f32.mrb[0].mxu1 }
 0x1fe   :  { %237 = vperm.xlu0 %965, %v231_v19   ;;  %v795_v20 = vpop.f32.mrb[1].mxu1  ;;  %v588_v19 = vrot.slane %v1225_v14, %v587_v16 }
 0x27d   :  { %v238_v21 = vpop.permute.xlu0 %237 }
 0x27e   :  { %v240_v22 = vsub.f32 %v158_v17, %v238_v21  ;;  %v583_v17 = vrot.slane %v1225_v14, %v582_v15 }
 0x280   :  { %v241_v23 = vmul.f32 %v240_v22, %v240_v22 }
 0x282   :  { %813 = vmatmul.mubr.msk.f32.vlgmr.msra.gmra.mrb[2].mxu0 %vm161_vm2, %v241_v23 }
 0x283   :  { %926 = vmatpush3.bf16.msra.mxu0 %v1098_v2  ;;  %850 = vmatprep.mubr.msk.f32.mxu0 %vm1096_vm0, %v1097_v1 }
 0x284   :  { %927 = vmatprep.subr.bf16.mxu0 %v1095_v0 }
 0x287   :  { %928 = vmatpush3.bf16.msra.mxu0 %v1098_v2 }
 0x288   :  { %929 = vmatprep.subr.bf16.mxu0 %v1095_v0 }
 0x28b   :  { %930 = vmatpush3.bf16.msra.mxu0 %v1098_v2 }
 0x28c   :  { %931 = vmatprep.subr.bf16.mxu0 %v1095_v0 }
 0x28f   :  { %932 = vmatpush3.bf16.msra.mxu0 %v1098_v2 }
 0x290   :  { %941 = vmatprep.subr.bf16.mxu0 %v1095_v0 }
 0x355   :  { %v311_v30 = vpop.f32.mrb[2].mxu0 }
 0x356   :  { %v312_v31 = vadd.f32 1e-05, %v311_v30  ;;  %v814_v32 = vpop.f32.mrb[3].mxu0 }
 0x358   :  { %967 = vrsqrt.f32 %v312_v31 }
 0x362   :  { %v968_v33 = vpop.eup %967 }
 0x363   :  { %318 = vperm.xlu0 %965, %v968_v33  }
 0x3e2   :  { %v319_v43 = vpop.permute.xlu0 %318 }
 0x3e3   :  { %v321_v45 = vmul.f32 %v319_v43, %v240_v22 }
 0x3e5   :  { %v326_v46 = vmul.f32 %v325_v42, %v321_v45 }
 0x3e7   :  { %v331_v47 = vadd.f32 %v330_v44, %v326_v46 }
 0x3e9   :  { %v333_v48 = vmul.f32 0.2, %v331_v47  ;;  %vm332_vm3 = vcmp.gt.f32.partialorder %v331_v47, 0.0 }
 0x3eb   :  { %v334_v49 = vsel %vm332_vm3, %v331_v47, %v333_v48 }
 0x3ec   :  { %832 = vmatmul.mubr.msk.f32.vlgmr.msra.gmra.mrb[2].mxu1 %vm161_vm2, %v334_v49 }
 0x3ed   :  { %934 = vmatpush3.bf16.msra.mxu1 %v1098_v2  ;;  %869 = vmatprep.mubr.msk.f32.mxu1 %vm1096_vm0, %v1097_v1 }
 0x3ee   :  { %935 = vmatprep.subr.bf16.mxu1 %v1095_v0 }
 0x3f1   :  { %936 = vmatpush3.bf16.msra.mxu1 %v1098_v2 }
 0x3f2   :  { %937 = vmatprep.subr.bf16.mxu1 %v1095_v0 }
 0x3f5   :  { %938 = vmatpush3.bf16.msra.mxu1 %v1098_v2 }
 0x3f6   :  { %939 = vmatprep.subr.bf16.mxu1 %v1095_v0 }
 0x3f9   :  { %940 = vmatpush3.bf16.msra.mxu1 %v1098_v2  ;;  %v596_v2 = vld [vmem:[#allocation8 + $0x18] sm:$0xff] }
 0x3fa   :  { %v945_v3 = vpack.c.bf16 %v596_v2, %v595_v62 }
 0x4bf   :  { %v416_v52 = vpop.f32.mrb[2].mxu1 }
 0x4c0   :  { %v417_v53 = vadd.f32 %v416_v52, %v346_v51  ;;  %v833_v54 = vpop.f32.mrb[3].mxu1 }
 0x4c2   :  { %851 = vmatmul.mubr.msk.f32.vlgmr.msra.gmra.mrb[4].mxu0 %vm161_vm2, %v417_v53 }
 0x4c3   :  { %888 = vmatprep.mubr.msk.f32.mxu0 %vm1096_vm0, %v1097_v1  ;;  %943 = vmatpush3.bf16.msra.mxu0 %v942_v63 }
 0x4c4   :  { %944 = vmatprep.subr.bf16.mxu0 %v1095_v0 }
 0x4c7   :  { %946 = vmatpush3.bf16.msra.mxu0 %v945_v3 }
 0x4c8   :  { %947 = vmatprep.subr.bf16.mxu0 %v1095_v0 }
 0x4cb   :  { %949 = vmatpush3.bf16.msra.mxu0 %v948_v9 }
 0x4cc   :  { %950 = vmatprep.subr.bf16.mxu0 %v1095_v0  ;;  %v705_v0 = vld [vmem:[%s1294_s5] ss:$0 sm:$0xff] }
 0x4cf   :  { %952 = vmatpush3.bf16.msra.mxu0 %v951_v13 }
 0x595   :  { %v489_v55 = vpop.f32.mrb[4].mxu0 }
 0x596   :  { %495 = vperm.xlu1 %966, %v489_v55   ;;  %v852_v56 = vpop.f32.mrb[5].mxu0 }
 0x615   :  { %v496_v57 = vpop.permute.xlu1 %495 }
 0x616   :  { %v498_v58 = vsub.f32 %v417_v53, %v496_v57 }
 0x618   :  { %v499_v59 = vmul.f32 %v498_v58, %v498_v58 }
 0x61a   :  { %870 = vmatmul.mubr.msk.f32.vlgmr.msra.gmra.mrb[4].mxu1 %vm161_vm2, %v499_v59 }
 0x6ed   :  { %v569_v1 = vpop.f32.mrb[4].mxu1 }
 0x6ee   :  { %v570_v4 = vadd.f32 1e-05, %v569_v1  ;;  %v871_v5 = vpop.f32.mrb[5].mxu1 }
 0x6f0   :  { %969 = vrsqrt.f32 %v570_v4 }
 0x6fa   :  { %v970_v6 = vpop.eup %969 }
 0x6fb   :  { %576 = vperm.xlu1 %966, %v970_v6  }
 0x77a   :  { %v577_v18 = vpop.permute.xlu1 %576 }
 0x77b   :  { %v579_v20 = vmul.f32 %v577_v18, %v498_v58 }
 0x77d   :  { %v584_v21 = vmul.f32 %v583_v17, %v579_v20 }
 0x77f   :  { %v589_v22 = vadd.f32 %v588_v19, %v584_v21 }
 0x781   :  { %v591_v23 = vmul.f32 0.2, %v589_v22  ;;  %vm590_vm4 = vcmp.gt.f32.partialorder %v589_v22, 0.0 }
 0x783   :  { %v592_v24 = vsel %vm590_vm4, %v589_v22, %v591_v23 }
 0x784   :  { %889 = vmatmul.mubr.msk.f32.vlgmr.msra.gmra.mrb[6].mxu0 %vm161_vm2, %v592_v24 }
 0x857   :  { %v677_v12 = vpop.f32.mrb[6].mxu0 }
 0x858   :  { %v678_v25 = vadd.f32 %v705_v0, %v677_v12  ;;  %v890_v26 = vpop.f32.mrb[7].mxu0 }
 0x85a   :  { %681 = vst [vmem:[#allocation10] sm:$0xff] %v678_v25 }
 0x85b   :  { %1070 = shalt.err (!%p1067_p8)
}
 0x85c   :  { %s1071_s26 = scalar_lea.hbm %s1295_s6, 128 }
 0x85d   :  { %p1072_p9 = scmp.ne.s32.totalorder %s1295_s6, %s1071_s26  ;;  %p1075_p10 = scmp.lt.u32.totalorder %s1071_s26, %s1295_s6 }
 0x85f   :  { %p1077_p11 = pnand %p1075_p10, %p1072_p9 }
 0x861   :  { %1080 = shalt.err (!%p1077_p11)
}
 0x862   :  { %691 = dma.vmem_to_hbm [thread:$0]  %s689_s22, 128, %s1295_s6, [#allocation4]  }
 0x863   :  { %1087 = dma.done.wait [#allocation4], 128  }
 0x864   :  { %1088 = vsyncadd [#allocation4], 4294967168 }
 0x865   :  { %695 = vsyncpa [#allocation3], 1 }
 0x866   :  { %696 = vsyncpa [#allocation6], 1 }
 0x867   :  { %697 = vsyncpa [#allocation9], 1 }
 0x868   :  { %698 = vsyncpa [#allocation4], 1 }

</bundles_post_ra>
